<compile_context>
chip_gen: v5e
topology: v5e:2x2
jax: 0.10.0
libtpu: 0.0.40
codegen_flags: <defaults>
</compile_context>

<pallas_src>
import functools

import jax
import jax.numpy as jnp
from jax.experimental import pallas as pl
from jax.experimental.pallas import tpu as pltpu


def _round_up(x, m):
    return ((x + m - 1) // m) * m


def critic_kernel(x_ref, w1_ref, b1_ref, w2_ref, b2_ref, w3_ref, b3_ref, o_ref):
    # Raw f32 state tile -> bf16 MXU operand (f32 accumulation).
    x = x_ref[...].astype(jnp.bfloat16)

    # fc1 + relu (elementwise math stays in f32)
    h = jnp.dot(x, w1_ref[...], preferred_element_type=jnp.float32) + b1_ref[...]
    h = jnp.maximum(h, 0.0)

    # fc2 + relu
    h = jnp.dot(h.astype(jnp.bfloat16), w2_ref[...],
                preferred_element_type=jnp.float32) + b2_ref[...]
    h = jnp.maximum(h, 0.0)

    # fc3 (no activation): compute on the lane-padded weight block, then store
    # only the true O output columns (masked vst; no 128-wide zero writeback).
    res = jnp.dot(h.astype(jnp.bfloat16), w3_ref[...],
                  preferred_element_type=jnp.float32) + b3_ref[...]
    o_ref[...] = res[:, : o_ref.shape[-1]]


def prepare_params(w1, b1, w2, b2, w3, b3):
    """One-time preprocessing (run OUTSIDE the hot path): pad the hidden/output
    feature dims to lane width and cast weights to bf16.  Weights are stored
    (in, out), i.e. the transpose of torch's Linear.weight."""
    D, H = w1.shape
    O = w3.shape[1]
    H_pad = _round_up(H, 128)
    O_pad = _round_up(O, 128)

    def pad2(a, rows, cols, dtype):
        out = jnp.zeros((rows, cols), dtype)
        return out.at[: a.shape[0], : a.shape[1]].set(a.astype(dtype))

    return (
        pad2(w1, D, H_pad, jnp.bfloat16),                  # (D, H_pad)  K un-padded
        pad2(b1.reshape(1, -1), 1, H_pad, jnp.float32),
        pad2(w2, H_pad, H_pad, jnp.bfloat16),              # (H_pad, H_pad)
        pad2(b2.reshape(1, -1), 1, H_pad, jnp.float32),
        pad2(w3, H_pad, O_pad, jnp.bfloat16),              # (H_pad, O_pad)
        pad2(b3.reshape(1, -1), 1, O_pad, jnp.float32),
    )


@functools.partial(jax.jit, static_argnames=("output_dims", "batch_tile"))
def critic_forward(state, w1_p, b1_p, w2_p, b2_p, w3_p, b3_p, *,
                   output_dims, batch_tile=512):
    """state: (B, D) f32; params from prepare_params(). Returns (B, output_dims) f32."""
    B, D = state.shape
    H_pad = w1_p.shape[1]
    O_pad = w3_p.shape[1]
    O = int(output_dims)

    # ---- batch tiling ---------------------------------------------------------
    batch_tile = max(8, _round_up(int(batch_tile), 8))   # defensive: legal sublane dim
    B8 = _round_up(B, 8)
    if B8 <= batch_tile:
        TB = B8
    else:
        # >= 4 grid steps (feeds both v7x TensorCores + the double-buffer
        # pipeline); tiles a multiple of 256 (MXU-friendly on v5e/v6e/v7x).
        TB = min(_round_up(batch_tile, 256),
                 max(256, _round_up(pl.cdiv(B8, 4), 256)))
    B_pad = _round_up(B, TB)
    n_tiles = B_pad // TB

    # Row-pad only when B isn't a tile multiple (no lane pad, no dtype change).
    x = state
    if B_pad != B:
        x = jnp.zeros((B_pad, D), state.dtype).at[:B].set(state)

    # ---- VMEM budget: exact estimate + 25% headroom, per-generation ceiling ----
    D_lane = _round_up(D, 128)
    O_lane = _round_up(O, 128)
    est = (
        2 * 4 * TB * D_lane                                                 # f32 state tiles (x2 bufs)
        + 2 * 4 * TB * O_lane                                               # f32 output tiles (x2 bufs)
        + 2 * (_round_up(D, 8) * H_pad + H_pad * H_pad + H_pad * O_pad)     # resident bf16 weights
        + 4 * 8 * (2 * H_pad + O_pad)                                       # f32 biases (sublane-padded)
        + 3 * 4 * TB * H_pad                                                # f32/bf16 hidden temporaries
    )
    try:
        vmem_cap = int(pltpu.get_tpu_info().vmem_capacity_bytes)
    except Exception:
        vmem_cap = 64 * 2**20                     # conservative fallback (v7x per-TC)
    vmem_ceiling = int(vmem_cap * 0.8)            # ~51 MiB v7x, ~102 MiB v5e/v6e
    want = int(est * 1.25)
    if want > vmem_ceiling:
        # TODO(synk): tile w2 over a second (K) grid axis for very large hidden_units.
        raise ValueError(
            f"CriticNetwork kernel needs ~{want} B of VMEM (> {vmem_ceiling} B budget); "
            "reduce batch_tile or hidden_units.")
    vmem_limit = min(max(want, 16 * 2**20), vmem_ceiling)

    out = pl.pallas_call(
        critic_kernel,
        out_shape=jax.ShapeDtypeStruct((B_pad, O), jnp.float32),
        grid=(n_tiles,),
        in_specs=[
            pl.BlockSpec((TB, D), lambda i: (i, 0)),          # raw f32 state tile
            pl.BlockSpec((D, H_pad), lambda i: (0, 0)),       # w1 (resident)
            pl.BlockSpec((1, H_pad), lambda i: (0, 0)),       # b1
            pl.BlockSpec((H_pad, H_pad), lambda i: (0, 0)),   # w2
            pl.BlockSpec((1, H_pad), lambda i: (0, 0)),       # b2
            pl.BlockSpec((H_pad, O_pad), lambda i: (0, 0)),   # w3
            pl.BlockSpec((1, O_pad), lambda i: (0, 0)),       # b3
        ],
        out_specs=pl.BlockSpec((TB, O), lambda i: (i, 0)),    # true-width value head
        compiler_params=pltpu.CompilerParams(
            dimension_semantics=("parallel",),
            vmem_limit_bytes=vmem_limit,
        ),
    )(x, w1_p, b1_p, w2_p, b2_p, w3_p, b3_p)

    return out[:B] if B_pad != B else out


def init_params(key, input_dims, hidden_units, output_dims):
    """Deterministic PyTorch-style Linear init: U(-1/sqrt(fan_in), 1/sqrt(fan_in))."""
    ks = jax.random.split(key, 6)

    def linear(kw, kb, fan_in, fan_out):
        bound = 1.0 / jnp.sqrt(fan_in)
        # stored as (in, out) == PyTorch weight (out, in) transposed
        w = jax.random.uniform(kw, (fan_in, fan_out), jnp.float32, -bound, bound)
        b = jax.random.uniform(kb, (1, fan_out), jnp.float32, -bound, bound)
        return w, b

    w1, b1 = linear(ks[0], ks[1], input_dims, hidden_units)
    w2, b2 = linear(ks[2], ks[3], hidden_units, hidden_units)
    w3, b3 = linear(ks[4], ks[5], hidden_units, output_dims)
    return w1, b1, w2, b2, w3, b3


def reference_forward(state, w1, b1, w2, b2, w3, b3):
    # Mirrors the kernel's bf16-operand / f32-accumulate numerics.
    bf = lambda a: a.astype(jnp.bfloat16)
    h = jnp.dot(bf(state), bf(w1), preferred_element_type=jnp.float32) + b1
    h = jnp.maximum(h, 0.0)
    h = jnp.dot(bf(h), bf(w2), preferred_element_type=jnp.float32) + b2
    h = jnp.maximum(h, 0.0)
    return jnp.dot(bf(h), bf(w3), preferred_element_type=jnp.float32) + b3


if __name__ == "__main__":
    key = jax.random.PRNGKey(0)
    k_params, k_state = jax.random.split(key)

    batch = 8
    input_dims = 8
    hidden_units = 16   # module default
    output_dims = 1     # critic value head

    raw_params = init_params(k_params, input_dims, hidden_units, output_dims)
    state = jax.random.normal(k_state, (batch, input_dims), jnp.float32)

    # One-time parameter preprocessing (outside the jitted hot path).
    params = prepare_params(*raw_params)

    out = critic_forward(state, *params, output_dims=output_dims)
    out = jax.block_until_ready(out)

    ref = reference_forward(state, *raw_params)
    assert out.shape == (batch, output_dims), out.shape
    assert jnp.allclose(out, ref, atol=1e-3, rtol=1e-3), (out, ref)

    print("KERNEL_OK")
</pallas_src>

<mosaic_0001>
module attributes {stable_mosaic.version = 11 : i64} {
  func.func @critic_kernel(%arg0: i32, %arg1: memref<8x8xf32, #tpu.memory_space<vmem>>, %arg2: memref<8x128xbf16, #tpu.memory_space<vmem>>, %arg3: memref<1x128xf32, #tpu.memory_space<vmem>>, %arg4: memref<128x128xbf16, #tpu.memory_space<vmem>>, %arg5: memref<1x128xf32, #tpu.memory_space<vmem>>, %arg6: memref<128x128xbf16, #tpu.memory_space<vmem>>, %arg7: memref<1x128xf32, #tpu.memory_space<vmem>>, %arg8: memref<8x1xf32, #tpu.memory_space<vmem>>) attributes {dimension_semantics = [#tpu.dimension_semantics<parallel>], iteration_bounds = array<i64: 1>, scalar_prefetch = 0 : i64, scratch_operands = 0 : i64, tpu.core_type = #tpu.core_type<tc>, window_params = [{transform_indices = @transform_0, window_bounds = array<i64: 8, 8>}, {pipeline_mode = #tpu.pipeline_mode<synchronous>, transform_indices = @transform_1, window_bounds = array<i64: 8, 128>}, {pipeline_mode = #tpu.pipeline_mode<synchronous>, transform_indices = @transform_2, window_bounds = array<i64: 1, 128>}, {pipeline_mode = #tpu.pipeline_mode<synchronous>, transform_indices = @transform_3, window_bounds = array<i64: 128, 128>}, {pipeline_mode = #tpu.pipeline_mode<synchronous>, transform_indices = @transform_4, window_bounds = array<i64: 1, 128>}, {pipeline_mode = #tpu.pipeline_mode<synchronous>, transform_indices = @transform_5, window_bounds = array<i64: 128, 128>}, {pipeline_mode = #tpu.pipeline_mode<synchronous>, transform_indices = @transform_6, window_bounds = array<i64: 1, 128>}, {transform_indices = @transform_7, window_bounds = array<i64: 8, 1>}]} {
    %c0 = arith.constant 0 : index
    %c0_0 = arith.constant 0 : index
    %0 = vector.load %arg1[%c0, %c0_0] : memref<8x8xf32, #tpu.memory_space<vmem>>, vector<8x8xf32>
    %1 = arith.truncf %0 : vector<8x8xf32> to vector<8x8xbf16>
    %c0_1 = arith.constant 0 : index
    %c0_2 = arith.constant 0 : index
    %2 = vector.load %arg2[%c0_1, %c0_2] : memref<8x128xbf16, #tpu.memory_space<vmem>>, vector<8x128xbf16>
    %cst = arith.constant dense<0.000000e+00> : vector<8x128xf32>
    %3 = tpu.matmul %1, %2, %cst {dimension_numbers = #tpu.dot_dimension_numbers<[1], [0], [0], [1], [0, 0, 1, 1], [], []>} : vector<8x8xbf16>, vector<8x128xbf16>, vector<8x128xf32> -> vector<8x128xf32>
    %c0_3 = arith.constant 0 : index
    %c0_4 = arith.constant 0 : index
    %4 = vector.load %arg3[%c0_3, %c0_4] : memref<1x128xf32, #tpu.memory_space<vmem>>, vector<1x128xf32>
    %5 = vector.broadcast %4 : vector<1x128xf32> to vector<8x128xf32>
    %6 = arith.addf %3, %5 : vector<8x128xf32>
    %cst_5 = arith.constant 0.000000e+00 : f32
    %7 = vector.broadcast %cst_5 : f32 to vector<8x128xf32>
    %8 = arith.maximumf %6, %7 : vector<8x128xf32>
    %9 = arith.truncf %8 : vector<8x128xf32> to vector<8x128xbf16>
    %c0_6 = arith.constant 0 : index
    %c0_7 = arith.constant 0 : index
    %10 = vector.load %arg4[%c0_6, %c0_7] : memref<128x128xbf16, #tpu.memory_space<vmem>>, vector<128x128xbf16>
    %cst_8 = arith.constant dense<0.000000e+00> : vector<8x128xf32>
    %11 = tpu.matmul %9, %10, %cst_8 {dimension_numbers = #tpu.dot_dimension_numbers<[1], [0], [0], [1], [0, 0, 1, 1], [], []>} : vector<8x128xbf16>, vector<128x128xbf16>, vector<8x128xf32> -> vector<8x128xf32>
    %c0_9 = arith.constant 0 : index
    %c0_10 = arith.constant 0 : index
    %12 = vector.load %arg5[%c0_9, %c0_10] : memref<1x128xf32, #tpu.memory_space<vmem>>, vector<1x128xf32>
    %13 = vector.broadcast %12 : vector<1x128xf32> to vector<8x128xf32>
    %14 = arith.addf %11, %13 : vector<8x128xf32>
    %cst_11 = arith.constant 0.000000e+00 : f32
    %15 = vector.broadcast %cst_11 : f32 to vector<8x128xf32>
    %16 = arith.maximumf %14, %15 : vector<8x128xf32>
    %17 = arith.truncf %16 : vector<8x128xf32> to vector<8x128xbf16>
    %c0_12 = arith.constant 0 : index
    %c0_13 = arith.constant 0 : index
    %18 = vector.load %arg6[%c0_12, %c0_13] : memref<128x128xbf16, #tpu.memory_space<vmem>>, vector<128x128xbf16>
    %cst_14 = arith.constant dense<0.000000e+00> : vector<8x128xf32>
    %19 = tpu.matmul %17, %18, %cst_14 {dimension_numbers = #tpu.dot_dimension_numbers<[1], [0], [0], [1], [0, 0, 1, 1], [], []>} : vector<8x128xbf16>, vector<128x128xbf16>, vector<8x128xf32> -> vector<8x128xf32>
    %c0_15 = arith.constant 0 : index
    %c0_16 = arith.constant 0 : index
    %20 = vector.load %arg7[%c0_15, %c0_16] : memref<1x128xf32, #tpu.memory_space<vmem>>, vector<1x128xf32>
    %21 = vector.broadcast %20 : vector<1x128xf32> to vector<8x128xf32>
    %22 = arith.addf %19, %21 : vector<8x128xf32>
    %23 = vector.extract_strided_slice %22 {offsets = [0, 0], sizes = [8, 1], strides = [1, 1]} : vector<8x128xf32> to vector<8x1xf32>
    %c0_17 = arith.constant 0 : index
    %c0_18 = arith.constant 0 : index
    %24 = vector.load %arg8[%c0_17, %c0_18] : memref<8x1xf32, #tpu.memory_space<vmem>>, vector<8x1xf32>
    tpu.vector_store %arg8[%c0_17, %c0_18], %23 {strides = array<i32>} : memref<8x1xf32, #tpu.memory_space<vmem>>, vector<8x1xf32>,
    return
  }
  func.func @transform_0(%arg0: i32) -> (i32, i32) {
    %c0_i32 = arith.constant 0 : i32
    %c0_i32_0 = arith.constant 0 : i32
    return %arg0, %c0_i32 : i32, i32
  }
  func.func @transform_1(%arg0: i32) -> (i32, i32) {
    %c0_i32 = arith.constant 0 : i32
    %c0_i32_0 = arith.constant 0 : i32
    %c0_i32_1 = arith.constant 0 : i32
    return %c0_i32, %c0_i32_0 : i32, i32
  }
  func.func @transform_2(%arg0: i32) -> (i32, i32) {
    %c0_i32 = arith.constant 0 : i32
    %c0_i32_0 = arith.constant 0 : i32
    %c0_i32_1 = arith.constant 0 : i32
    return %c0_i32, %c0_i32_0 : i32, i32
  }
  func.func @transform_3(%arg0: i32) -> (i32, i32) {
    %c0_i32 = arith.constant 0 : i32
    %c0_i32_0 = arith.constant 0 : i32
    %c0_i32_1 = arith.constant 0 : i32
    return %c0_i32, %c0_i32_0 : i32, i32
  }
  func.func @transform_4(%arg0: i32) -> (i32, i32) {
    %c0_i32 = arith.constant 0 : i32
    %c0_i32_0 = arith.constant 0 : i32
    %c0_i32_1 = arith.constant 0 : i32
    return %c0_i32, %c0_i32_0 : i32, i32
  }
  func.func @transform_5(%arg0: i32) -> (i32, i32) {
    %c0_i32 = arith.constant 0 : i32
    %c0_i32_0 = arith.constant 0 : i32
    %c0_i32_1 = arith.constant 0 : i32
    return %c0_i32, %c0_i32_0 : i32, i32
  }
  func.func @transform_6(%arg0: i32) -> (i32, i32) {
    %c0_i32 = arith.constant 0 : i32
    %c0_i32_0 = arith.constant 0 : i32
    %c0_i32_1 = arith.constant 0 : i32
    return %c0_i32, %c0_i32_0 : i32, i32
  }
  func.func @transform_7(%arg0: i32) -> (i32, i32) {
    %c0_i32 = arith.constant 0 : i32
    %c0_i32_0 = arith.constant 0 : i32
    return %arg0, %c0_i32 : i32, i32
  }
}

</mosaic_0001>

<bundles_post_ra>
// kernel: critic_forward.1
= control target key start
LH: loop header
LB: loop body
LE: loop exit
PB: predicated region body
PF: predicated region fallthrough
CT: control target
= control target key end

     0   :  { %12 = vsyncpa [#allocation3], 0  ;;  %s551_s0 = inlined_call_operand.hbm [shape: f32[8,8], index: 0, kind: input, shape index: {}]   ;;  %s552_s1 = inlined_call_operand.hbm [shape: bf16[8,128], index: 1, kind: input, shape index: {}]   ;;  %s553_s2 = inlined_call_operand.vmem [shape: f32[1,128], index: 2, kind: input, shape index: {}]   ;;  %s554_s3 = inlined_call_operand.hbm [shape: bf16[128,128], index: 3, kind: input, shape index: {}]   ;;  %s555_s4 = inlined_call_operand.vmem [shape: f32[1,128], index: 4, kind: input, shape index: {}]   ;;  %s556_s5 = inlined_call_operand.hbm [shape: bf16[128,128], index: 5, kind: input, shape index: {}]   ;;  %s557_s6 = inlined_call_operand.vmem [shape: f32[1,128], index: 6, kind: input, shape index: {}]   ;;  %s558_s7 = inlined_call_operand.vmem [shape: f32[8,1], index: 7, kind: output, shape index: {}]  }
   0x1   :  { %13 = vsyncpa [#allocation5], 0  ;;  %s31_s26 = sshll.u32 %s552_s1, 4  ;;  %s32_s26 = int_to_ptr.hbm [resolvable:$true] %s31_s26 }
   0x2   :  { %14 = vsyncpa [#allocation8], 0  ;;  %s481_s27 = smov [#allocation4]   ;;  %s20_s8 = sshll.u32 %s551_s0, 4  ;;  %s21_s8 = int_to_ptr.hbm [resolvable:$true] %s20_s8 }
   0x3   :  { %s33_s28 = sshll.u32 %s481_s27, 4  ;;  %s482_s9 = smov [#allocation2]   ;;  %s34_s28 = int_to_ptr.vmem [resolvable:$true] %s33_s28 }
   0x4   :  { %36 = dma.hbm_to_vmem [thread:$0]  %s32_s26, 64, %s34_s28, [#allocation5]  }
   0x5   :  { %s22_s10 = sshll.u32 %s482_s9, 4  ;;  %s43_s13 = sshll.u32 %s554_s3, 4  ;;  %s23_s10 = int_to_ptr.vmem [resolvable:$true] %s22_s10  ;;  %s44_s13 = int_to_ptr.hbm [resolvable:$true] %s43_s13 }
   0x6   :  { %25 = dma.hbm_to_vmem [thread:$0]  %s21_s8, 128, %s23_s10, [#allocation3]  }
   0x7   :  { %s483_s1 = smov [#allocation6]   ;;  %s58_s17 = sshll.u32 %s556_s5, 4  ;;  %s59_s17 = int_to_ptr.hbm [resolvable:$true] %s58_s17 }
   0x8   :  { %s45_s14 = sshll.u32 %s483_s1, 4  ;;  %s484_s18 = smov 64   ;;  %s46_s14 = int_to_ptr.vmem [resolvable:$true] %s45_s14 }
   0x9   :  { %s485_s0 = smov 4   ;;  %s486_s19 = smov [#allocation7]  }
   0xa   :  { %51 = dma.hbm_to_vmem [thread:$0]  %s44_s13, 1024, %s46_s14, [#allocation5], %s484_s18, %s484_s18, %s485_s0  }
   0xb   :  { %s60_s20 = sshll.u32 %s486_s19, 4  ;;  %s61_s20 = int_to_ptr.vmem [resolvable:$true] %s60_s20 }
   0xc   :  { %66 = dma.hbm_to_vmem [thread:$0]  %s59_s17, 1024, %s61_s20, [#allocation8], %s484_s18, %s484_s18, %s485_s0  }
   0xd   :  { %475 = dma.done.wait [#allocation3], 128  }
   0xe   :  { %476 = vsyncadd [#allocation3], 4294967168 }
   0xf   :  { %477 = dma.done.wait [#allocation5], 1088  }
  0x10   :  { %478 = vsyncadd [#allocation5], 4294966208 }
  0x11   :  { %479 = dma.done.wait [#allocation8], 1024  }
  0x12   :  { %480 = vsyncadd [#allocation8], 4294966272  ;;  %vm97_vm0 = vcmask 1043456   ;;  %v88_v0 = vld [vmem:[#allocation4] sm:$0xf]  ;;  %v86_v1 = vld [vmem:[#allocation2] sm:$0xff] }
  0x13   :  { %v361_v2 = vld [vmem:[#allocation6 + $0x38] sm:$0xff]  ;;  %v99_v3 = vsel %vm97_vm0, %v88_v0, 0  ;;  %v87_v4 = vpack.c.bf16 %v86_v1, %v86_v1  ;;  %vm93_vm1 = vcmask 64512   ;;  %v360_v5 = vld [vmem:[#allocation6 + $0x30] sm:$0xff]  ;;  %v359_v6 = vld [vmem:[#allocation6 + $0x28] sm:$0xff]  ;;  %vm280_vm2 = vcmask 7168  }
  0x14   :  { %108 = vmatpush.bf16.msra.mxu0 %v99_v3  ;;  %184 = vmatpush.bf16.msra.mxu1 %v361_v2  ;;  %v358_v7 = vld [vmem:[#allocation6 + $0x20] sm:$0xff]  ;;  %v357_v8 = vld [vmem:[#allocation6 + $0x18] sm:$0xff]  ;;  %v356_v9 = vld [vmem:[#allocation6 + $0x10] sm:$0xff] }
  0x15   :  { %v355_v10 = vld [vmem:[#allocation6 + $0x8] sm:$0xff]  ;;  %v354_v11 = vld [vmem:[#allocation6] sm:$0xff]  ;;  %v369_v12 = vld [vmem:[#allocation7 + $0x38] sm:$0xff] }
  0x16   :  { %267 = vmatpush.bf16.msra.mxu2 %v369_v12  ;;  %v368_v13 = vld [vmem:[#allocation7 + $0x30] sm:$0xff]  ;;  %v367_v14 = vld [vmem:[#allocation7 + $0x28] sm:$0xff]  ;;  %v366_v15 = vld [vmem:[#allocation7 + $0x20] sm:$0xff] }
  0x17   :  { %289 = vmatmul.msk.bf16.vlgmr.msra.gmra.mxu0 %vm93_vm1, %v87_v4  ;;  %v365_v16 = vld [vmem:[#allocation7 + $0x18] sm:$0xff]  ;;  %v364_v17 = vld [vmem:[#allocation7 + $0x10] sm:$0xff]  ;;  %v363_v24 = vld [vmem:[#allocation7 + $0x8] sm:$0xff] }
  0x18   :  { %185 = vmatpush.bf16.msra.mxu1 %v360_v5  ;;  %v376_v18 = vld [vmem:[%s553_s2] ss:$0 sm:$0xff]  ;;  %v362_v25 = vld [vmem:[#allocation7] sm:$0xff] }
  0x19   :  { %v377_v26 = vld [vmem:[%s555_s4] ss:$0 sm:$0xff] }
  0x1a   :  { %268 = vmatpush.bf16.msra.mxu2 %v368_v13  ;;  %v378_v32 = vld [vmem:[%s557_s6] ss:$0 sm:$0xff] }
  0x1c   :  { %186 = vmatpush.bf16.msra.mxu1 %v359_v6 }
  0x1e   :  { %269 = vmatpush.bf16.msra.mxu2 %v367_v14 }
  0x20   :  { %187 = vmatpush.bf16.msra.mxu1 %v358_v7 }
  0x22   :  { %270 = vmatpush.bf16.msra.mxu2 %v366_v15 }
  0x24   :  { %188 = vmatpush.bf16.msra.mxu1 %v357_v8 }
  0x26   :  { %271 = vmatpush.bf16.msra.mxu2 %v365_v16 }
  0x28   :  { %189 = vmatpush.bf16.msra.mxu1 %v356_v9 }
  0x2a   :  { %272 = vmatpush.bf16.msra.mxu2 %v364_v17 }
  0x2c   :  { %190 = vmatpush.bf16.msra.mxu1 %v355_v10 }
  0x2e   :  { %273 = vmatpush.bf16.msra.mxu2 %v363_v24 }
  0x30   :  { %191 = vmatpush.bf16.msra.mxu1 %v354_v11 }
  0x32   :  { %274 = vmatpush.bf16.msra.mxu2 %v362_v25 }
  0x94   :  { %v110_v19 = vpop.f32.mrf.mxu0 }
  0x95   :  { %v111_v20 = vadd.f32 %v376_v18, %v110_v19 }
  0x97   :  { %v114_v21 = vmax.f32 %v111_v20, 0.0 }
  0x99   :  { %v115_v22 = vpack.c.bf16 %v114_v21, %v114_v21 }
  0x9b   :  { %192 = vmatmul.bf16.vlgmr.msra.gmra.mxu1 %v115_v22 }
  0x9c   :  { %v112_v23 = vpop.f32.mrf.mxu0 }
 0x118   :  { %v193_v27 = vpop.f32.mrf.mxu1 }
 0x119   :  { %v194_v28 = vadd.f32 %v377_v26, %v193_v27 }
 0x11b   :  { %v197_v29 = vmax.f32 %v194_v28, 0.0 }
 0x11d   :  { %v198_v30 = vpack.c.bf16 %v197_v29, %v197_v29 }
 0x11f   :  { %275 = vmatmul.bf16.vlgmr.msra.gmra.mxu2 %v198_v30 }
 0x120   :  { %v195_v31 = vpop.f32.mrf.mxu1 }
 0x1a2   :  { %v276_v33 = vpop.f32.mrf.mxu2 }
 0x1a3   :  { %v277_v34 = vadd.f32 %v378_v32, %v276_v33 }
 0x1a5   :  { %281 = vst.msk [vmem:[%s558_s7] sm:$0xff] %vm280_vm2, %v277_v34 }
 0x1aa   :  { %v278_v35 = vpop.f32.mrf.mxu2 }
 0x1ab   :  { %286 = vsyncpa [#allocation3], 1 }
 0x1ac   :  { %287 = vsyncpa [#allocation5], 1 }
 0x1ad   :  { %288 = vsyncpa [#allocation8], 1 }

</bundles_post_ra>
